<compile_context>
chip_gen: v5e
topology: v5e:2x2
jax: 0.10.0
libtpu: 0.0.40
codegen_flags: <defaults>
</compile_context>

<pallas_src>
import functools

import jax
import jax.numpy as jnp
import numpy as np
from jax.experimental import pallas as pl
from jax.experimental.pallas import tpu as pltpu


def _make_kernel(HW, thw, bn, needs_mask):
    """Build the kernel body for a fixed tiling configuration."""

    def kernel(x_ref, w1t_ref, w2t_ref, o_ref, sum_ref, max_ref):
        # x_ref : (bn, C, thw)  native-dtype NCHW tile (spatial on lanes)
        # w1t   : (C, Ch)       fc1 weight, transposed   (Ch = C // 16)
        # w2t   : (Ch, C)       fc2 weight, transposed
        # o_ref : (bn, C)
        # sum_ref / max_ref : (bn, C) f32 running accumulators
        k = pl.program_id(1)
        nk = pl.num_programs(1)

        @pl.when(k == 0)
        def _init():
            sum_ref[...] = jnp.zeros_like(sum_ref)
            max_ref[...] = jnp.full_like(max_ref, -jnp.inf)

        x = x_ref[...]                                   # (bn, C, thw)

        if needs_mask:
            # Last spatial tile may hang past HW: mask padded lanes so they
            # never enter the sum or the max.
            valid = HW - k * thw
            idx = jax.lax.broadcasted_iota(jnp.int32, x.shape, 2)
            m = idx < valid
            xs = jnp.where(m, x, jnp.asarray(0, dtype=x.dtype))
            xm = jnp.where(m, x, jnp.asarray(-jnp.inf, dtype=x.dtype))
        else:
            xs = x
            xm = x

        # Accumulate in f32 scratch (no full-tile f32 materialization).
        sum_ref[...] += jnp.sum(xs, axis=-1, dtype=jnp.float32)
        max_ref[...] = jnp.maximum(
            max_ref[...], jnp.max(xm, axis=-1).astype(jnp.float32))

        @pl.when(k == nk - 1)
        def _finalize():
            avg = sum_ref[...] / jnp.float32(HW)         # (bn, C)
            mx = max_ref[...]                            # (bn, C)
            # Shared MLP on both pooled vectors at once: one small matmul.
            pooled = jnp.concatenate([avg, mx], axis=0)  # (2*bn, C)
            h = jnp.maximum(
                jnp.dot(pooled, w1t_ref[...],
                        preferred_element_type=jnp.float32), 0.0)
            out = jnp.dot(h, w2t_ref[...],
                          preferred_element_type=jnp.float32)  # (2*bn, C)
            s = out[:bn] + out[bn:]                      # avg_out + max_out
            o_ref[...] = jax.nn.sigmoid(s).astype(o_ref.dtype)

    return kernel


def _pick_tiling(N, C, HW, itemsize, max_block_bytes):
    """Choose (bn, thw) so blocks are ~max_block_bytes and VMEM-safe."""
    per_img = C * HW * itemsize
    if per_img <= max_block_bytes:
        # Whole spatial extent per step; pack images per step.  bn must be
        # N itself, a multiple of 8 dividing N, or 1 (sublane-tiling rule
        # on the 2-D output block).
        cands = [N] + [d for d in range(8 * (N // 8), 0, -8) if N % d == 0] + [1]
        for bn in cands:
            if bn * per_img <= max_block_bytes:
                return bn, HW
        return 1, HW
    # Image too big for one block: one image per step, tile the spatial axis
    # in lane-aligned (multiple-of-128) chunks.
    thw = (max_block_bytes // (C * itemsize)) // 128 * 128
    thw = max(thw, 128)
    thw = min(thw, HW) if HW % 128 == 0 else thw
    return 1, thw


def channel_attention2(x_nchw, w1, w2, *,
                       max_block_bytes=2 * 1024 * 1024,
                       vmem_limit_bytes=32 * 1024 * 1024):
    """x_nchw: (N, C, H, W); w1: (C//16, C, 1, 1); w2: (C, C//16, 1, 1)."""
    N, C, H, W = x_nchw.shape
    Ch = w1.shape[0]
    assert w1.shape == (Ch, C, 1, 1) and w2.shape == (C, Ch, 1, 1)
    HW = H * W
    itemsize = jnp.dtype(x_nchw.dtype).itemsize

    # Free reshape (trailing dims merge) -- no HBM relayout, stays NCHW.
    x = x_nchw.reshape(N, C, HW)
    # Squeeze/transpose the 1x1-conv weights so both matmuls are lane-dense.
    w1t = jnp.transpose(w1.reshape(Ch, C), (1, 0))       # (C, Ch)
    w2t = jnp.transpose(w2.reshape(C, Ch), (1, 0))       # (Ch, C)

    bn, thw = _pick_tiling(N, C, HW, itemsize, max_block_bytes)
    needs_mask = (HW % thw) != 0
    grid = (N // bn, pl.cdiv(HW, thw))

    kernel = _make_kernel(HW, thw, bn, needs_mask)

    out = pl.pallas_call(
        kernel,
        out_shape=jax.ShapeDtypeStruct((N, C), x_nchw.dtype),
        grid_spec=pltpu.PrefetchScalarGridSpec(
            num_scalar_prefetch=0,
            grid=grid,
            in_specs=[
                pl.BlockSpec((bn, C, thw), lambda n, k: (n, 0, k)),
                pl.BlockSpec((C, Ch), lambda n, k: (0, 0)),
                pl.BlockSpec((Ch, C), lambda n, k: (0, 0)),
            ],
            out_specs=pl.BlockSpec((bn, C), lambda n, k: (n, 0)),
            scratch_shapes=[
                pltpu.VMEM((bn, C), jnp.float32),   # running sum
                pltpu.VMEM((bn, C), jnp.float32),   # running max
            ],
        ),
        compiler_params=pltpu.CompilerParams(
            dimension_semantics=("parallel", "arbitrary"),
            vmem_limit_bytes=vmem_limit_bytes,
        ),
    )(x, w1t, w2t)

    return out.reshape(N, C, 1, 1)


def channel_attention2_ref(x_nchw, w1, w2):
    """Pure-JAX reference mirroring the PyTorch forward (NCHW)."""
    N, C, H, W = x_nchw.shape
    Ch = w1.shape[0]
    w1m = w1.reshape(Ch, C)
    w2m = w2.reshape(C, Ch)
    avg = jnp.mean(x_nchw, axis=(2, 3))                  # (N, C)
    mx = jnp.max(x_nchw, axis=(2, 3))                    # (N, C)

    def mlp(v):  # v: (N, C)
        h = jnp.maximum(v @ w1m.T, 0.0)                  # (N, Ch)
        return h @ w2m.T                                 # (N, C)

    out = jax.nn.sigmoid(mlp(avg) + mlp(mx))
    return out.reshape(N, C, 1, 1)


if __name__ == "__main__":
    key = jax.random.PRNGKey(0)

    def run_case(N, C, H, W, **kw):
        Ch = C // 16
        kc = jax.random.fold_in(key, N * 100003 + C * 131 + H * 7 + W)
        kx, k1, k2 = jax.random.split(kc, 3)
        x = jax.random.normal(kx, (N, C, H, W), dtype=jnp.float32)
        # Deterministic, Kaiming-ish init for the bias-free 1x1-conv weights.
        w1 = jax.random.normal(k1, (Ch, C, 1, 1), dtype=jnp.float32) * (2.0 / C) ** 0.5
        w2 = jax.random.normal(k2, (C, Ch, 1, 1), dtype=jnp.float32) * (2.0 / Ch) ** 0.5

        out = jax.block_until_ready(channel_attention2(x, w1, w2, **kw))
        ref = channel_attention2_ref(x, w1, w2)
        np.testing.assert_allclose(np.asarray(out), np.asarray(ref),
                                   rtol=1e-5, atol=1e-5)
        assert out.shape == (N, C, 1, 1)

    # Case 1: small shape -> whole image per block, both images packed in one
    # grid step (exercises the batch-packing + single-MLP path).
    run_case(2, 32, 16, 16)

    # Case 2: tiny block budget forces the tiled spatial reduction with a
    # masked (non multiple-of-128) tail tile (exercises the accumulator path).
    run_case(2, 32, 13, 13, max_block_bytes=16 * 1024)

    print("KERNEL_OK")
</pallas_src>

<mosaic_0001>
module attributes {stable_mosaic.version = 11 : i64} {
  func.func @kernel(%arg0: i32, %arg1: i32, %arg2: memref<2x32x256xf32, #tpu.memory_space<vmem>>, %arg3: memref<32x2xf32, #tpu.memory_space<vmem>>, %arg4: memref<2x32xf32, #tpu.memory_space<vmem>>, %arg5: memref<2x32xf32, #tpu.memory_space<vmem>>, %arg6: memref<2x32xf32, #tpu.memory_space<vmem>>, %arg7: memref<2x32xf32, #tpu.memory_space<vmem>>) attributes {dimension_semantics = [#tpu.dimension_semantics<parallel>, #tpu.dimension_semantics<arbitrary>], iteration_bounds = array<i64: 1, 1>, scalar_prefetch = 0 : i64, scratch_operands = 2 : i64, tpu.core_type = #tpu.core_type<tc>, window_params = [{transform_indices = @transform_0, window_bounds = array<i64: 2, 32, 256>}, {pipeline_mode = #tpu.pipeline_mode<synchronous>, transform_indices = @transform_1, window_bounds = array<i64: 32, 2>}, {pipeline_mode = #tpu.pipeline_mode<synchronous>, transform_indices = @transform_2, window_bounds = array<i64: 2, 32>}, {transform_indices = @transform_3, window_bounds = array<i64: 2, 32>}]} {
    %c0_i32 = arith.constant 0 : i32
    %0 = arith.cmpi eq, %arg1, %c0_i32 : i32
    %1 = arith.extui %0 : i1 to i32
    %c0_i32_0 = arith.constant 0 : i32
    %2 = arith.cmpi ne, %1, %c0_i32_0 : i32
    scf.if %2 {
      %cst_14 = arith.constant 0.000000e+00 : f32
      %15 = vector.broadcast %cst_14 : f32 to vector<2x32xf32>
      %c0_15 = arith.constant 0 : index
      %c0_16 = arith.constant 0 : index
      %16 = vector.load %arg6[%c0_15, %c0_16] : memref<2x32xf32, #tpu.memory_space<vmem>>, vector<2x32xf32>
      tpu.vector_store %arg6[%c0_15, %c0_16], %15 {strides = array<i32>} : memref<2x32xf32, #tpu.memory_space<vmem>>, vector<2x32xf32>,
      %cst_17 = arith.constant 0xFF800000 : f32
      %17 = vector.broadcast %cst_17 : f32 to vector<2x32xf32>
      %c0_18 = arith.constant 0 : index
      %c0_19 = arith.constant 0 : index
      %18 = vector.load %arg7[%c0_18, %c0_19] : memref<2x32xf32, #tpu.memory_space<vmem>>, vector<2x32xf32>
      tpu.vector_store %arg7[%c0_18, %c0_19], %17 {strides = array<i32>} : memref<2x32xf32, #tpu.memory_space<vmem>>, vector<2x32xf32>,
    } else {
    }
    %c0 = arith.constant 0 : index
    %c0_1 = arith.constant 0 : index
    %c0_2 = arith.constant 0 : index
    %3 = vector.load %arg2[%c0, %c0_1, %c0_2] : memref<2x32x256xf32, #tpu.memory_space<vmem>>, vector<2x32x256xf32>
    %c0_3 = arith.constant 0 : index
    %c0_4 = arith.constant 0 : index
    %4 = vector.load %arg6[%c0_3, %c0_4] : memref<2x32xf32, #tpu.memory_space<vmem>>, vector<2x32xf32>
    %cst = arith.constant dense<0.000000e+00> : vector<2x32xf32>
    %5 = vector.multi_reduction <add>, %3, %cst [2] : vector<2x32x256xf32> to vector<2x32xf32>
    %6 = arith.addf %4, %5 : vector<2x32xf32>
    %c0_5 = arith.constant 0 : index
    %c0_6 = arith.constant 0 : index
    %7 = vector.load %arg6[%c0_5, %c0_6] : memref<2x32xf32, #tpu.memory_space<vmem>>, vector<2x32xf32>
    tpu.vector_store %arg6[%c0_5, %c0_6], %6 {strides = array<i32>} : memref<2x32xf32, #tpu.memory_space<vmem>>, vector<2x32xf32>,
    %c0_7 = arith.constant 0 : index
    %c0_8 = arith.constant 0 : index
    %8 = vector.load %arg7[%c0_7, %c0_8] : memref<2x32xf32, #tpu.memory_space<vmem>>, vector<2x32xf32>
    %cst_9 = arith.constant dense<0xFF800000> : vector<2x32xf32>
    %9 = vector.multi_reduction <maximumf>, %3, %cst_9 [2] : vector<2x32x256xf32> to vector<2x32xf32>
    %10 = arith.maximumf %8, %9 : vector<2x32xf32>
    %c0_10 = arith.constant 0 : index
    %c0_11 = arith.constant 0 : index
    %11 = vector.load %arg7[%c0_10, %c0_11] : memref<2x32xf32, #tpu.memory_space<vmem>>, vector<2x32xf32>
    tpu.vector_store %arg7[%c0_10, %c0_11], %10 {strides = array<i32>} : memref<2x32xf32, #tpu.memory_space<vmem>>, vector<2x32xf32>,
    %c0_i32_12 = arith.constant 0 : i32
    %12 = arith.cmpi eq, %arg1, %c0_i32_12 : i32
    %13 = arith.extui %12 : i1 to i32
    %c0_i32_13 = arith.constant 0 : i32
    %14 = arith.cmpi ne, %13, %c0_i32_13 : i32
    scf.if %14 {
      %c0_14 = arith.constant 0 : index
      %c0_15 = arith.constant 0 : index
      %15 = vector.load %arg6[%c0_14, %c0_15] : memref<2x32xf32, #tpu.memory_space<vmem>>, vector<2x32xf32>
      %cst_16 = arith.constant 2.560000e+02 : f32
      %16 = vector.broadcast %cst_16 : f32 to vector<2x32xf32>
      %17 = arith.divf %15, %16 : vector<2x32xf32>
      %c0_17 = arith.constant 0 : index
      %c0_18 = arith.constant 0 : index
      %18 = vector.load %arg7[%c0_17, %c0_18] : memref<2x32xf32, #tpu.memory_space<vmem>>, vector<2x32xf32>
      %19 = tpu.concatenate %17, %18 in 0 : vector<2x32xf32>, vector<2x32xf32> -> vector<4x32xf32>
      %c0_19 = arith.constant 0 : index
      %c0_20 = arith.constant 0 : index
      %20 = vector.load %arg3[%c0_19, %c0_20] : memref<32x2xf32, #tpu.memory_space<vmem>>, vector<32x2xf32>
      %cst_21 = arith.constant dense<0.000000e+00> : vector<4x2xf32>
      %21 = tpu.matmul %19, %20, %cst_21 {dimension_numbers = #tpu.dot_dimension_numbers<[1], [0], [0], [1], [0, 0, 1, 1], [], []>} : vector<4x32xf32>, vector<32x2xf32>, vector<4x2xf32> -> vector<4x2xf32>
      %cst_22 = arith.constant 0.000000e+00 : f32
      %22 = vector.broadcast %cst_22 : f32 to vector<4x2xf32>
      %23 = arith.maximumf %21, %22 : vector<4x2xf32>
      %c0_23 = arith.constant 0 : index
      %c0_24 = arith.constant 0 : index
      %24 = vector.load %arg4[%c0_23, %c0_24] : memref<2x32xf32, #tpu.memory_space<vmem>>, vector<2x32xf32>
      %cst_25 = arith.constant dense<0.000000e+00> : vector<4x32xf32>
      %25 = tpu.matmul %23, %24, %cst_25 {dimension_numbers = #tpu.dot_dimension_numbers<[1], [0], [0], [1], [0, 0, 1, 1], [], []>} : vector<4x2xf32>, vector<2x32xf32>, vector<4x32xf32> -> vector<4x32xf32>
      %26 = vector.extract_strided_slice %25 {offsets = [0, 0], sizes = [2, 32], strides = [1, 1]} : vector<4x32xf32> to vector<2x32xf32>
      %27 = vector.extract_strided_slice %25 {offsets = [2, 0], sizes = [2, 32], strides = [1, 1]} : vector<4x32xf32> to vector<2x32xf32>
      %28 = arith.addf %26, %27 : vector<2x32xf32>
      %29 = arith.negf %28 : vector<2x32xf32>
      %30 = math.exp %29 : vector<2x32xf32>
      %cst_26 = arith.constant 1.000000e+00 : f32
      %31 = vector.broadcast %cst_26 : f32 to vector<2x32xf32>
      %32 = arith.addf %31, %30 : vector<2x32xf32>
      %33 = arith.divf %31, %32 : vector<2x32xf32>
      %c0_27 = arith.constant 0 : index
      %c0_28 = arith.constant 0 : index
      %34 = vector.load %arg5[%c0_27, %c0_28] : memref<2x32xf32, #tpu.memory_space<vmem>>, vector<2x32xf32>
      tpu.vector_store %arg5[%c0_27, %c0_28], %33 {strides = array<i32>} : memref<2x32xf32, #tpu.memory_space<vmem>>, vector<2x32xf32>,
    } else {
    }
    return
  }
  func.func @transform_0(%arg0: i32, %arg1: i32) -> (i32, i32, i32) {
    %c0_i32 = arith.constant 0 : i32
    %c0_i32_0 = arith.constant 0 : i32
    return %arg0, %c0_i32, %arg1 : i32, i32, i32
  }
  func.func @transform_1(%arg0: i32, %arg1: i32) -> (i32, i32) {
    %c0_i32 = arith.constant 0 : i32
    %c0_i32_0 = arith.constant 0 : i32
    %c0_i32_1 = arith.constant 0 : i32
    return %c0_i32, %c0_i32_0 : i32, i32
  }
  func.func @transform_2(%arg0: i32, %arg1: i32) -> (i32, i32) {
    %c0_i32 = arith.constant 0 : i32
    %c0_i32_0 = arith.constant 0 : i32
    %c0_i32_1 = arith.constant 0 : i32
    return %c0_i32, %c0_i32_0 : i32, i32
  }
  func.func @transform_3(%arg0: i32, %arg1: i32) -> (i32, i32) {
    %c0_i32 = arith.constant 0 : i32
    %c0_i32_0 = arith.constant 0 : i32
    return %arg0, %c0_i32 : i32, i32
  }
}

</mosaic_0001>

<bundles_post_ra>
// kernel: tpu_custom_call.1
= control target key start
LH: loop header
LB: loop body
LE: loop exit
PB: predicated region body
PF: predicated region fallthrough
CT: control target
= control target key end

     0   :  { %8 = vsyncpa [#allocation5], 0  ;;  %s421_s0 = inlined_call_operand.hbm [shape: f32[2,32,256], index: 0, kind: input, shape index: {}]   ;;  %s422_s1 = inlined_call_operand.vmem [shape: f32[32,2], index: 1, kind: input, shape index: {}]   ;;  %s423_s2 = inlined_call_operand.vmem [shape: f32[2,32], index: 2, kind: input, shape index: {}]   ;;  %s424_s3 = inlined_call_operand.hbm [shape: f32[2,32], index: 3, kind: output, shape index: {}]  }
   0x1   :  { %9 = vsyncpa [#allocation6], 0  ;;  %s14_s14 = sshll.u32 %s421_s0, 4  ;;  %s351_s15 = smov [#allocation4]   ;;  %s15_s14 = int_to_ptr.hbm [resolvable:$true] %s14_s14 }
   0x2   :  { %s16_s16 = sshll.u32 %s351_s15, 4  ;;  %s352_s17 = smov 256   ;;  %s17_s16 = int_to_ptr.vmem [resolvable:$true] %s16_s16 }
   0x3   :  { %s353_s18 = smov 16  }
   0x4   :  { %22 = dma.hbm_to_vmem [thread:$0]  %s15_s14, 2048, %s17_s16, [#allocation5], %s352_s17, %s352_s17, %s353_s18  }
   0x5   :  { %347 = dma.done.wait [#allocation5], 2048  }
   0x6   :  { %348 = vsyncadd [#allocation5], 4294965248  ;;  %v46_v0 = vld [vmem:[#allocation4 + $0x40] sm:$0xff]  ;;  %v47_v1 = vld [vmem:[#allocation4 + $0x48] sm:$0xff]  ;;  %vm35_vm0 = vcmask 254976   ;;  %v354_v32 = vmov 0.0   ;;  %v87_v46 = vlaneseq }
   0x7   :  { %v38_v2 = vld [vmem:[#allocation4] sm:$0xff]  ;;  %v67_v3 = vadd.f32 %v47_v1, %v46_v0  ;;  %v39_v4 = vld [vmem:[#allocation4 + $0x8] sm:$0xff]  ;;  %v48_v7 = vld [vmem:[#allocation4 + $0x50] sm:$0xff]  ;;  %v128_v18 = vmax.f32 %v46_v0, %v47_v1  ;;  %36 = vst.msk [vmem:[#allocation2] sm:$0x3] %vm35_vm0, %v354_v32  ;;  %v355_v36 = vmov -inf  }
   0x8   :  { %v116_v5 = vmax.f32 %v38_v2, %v39_v4  ;;  %v55_v6 = vadd.f32 %v39_v4, %v38_v2  ;;  %v49_v8 = vld [vmem:[#allocation4 + $0x58] sm:$0xff]  ;;  %v40_v9 = vld [vmem:[#allocation4 + $0x10] sm:$0xff]  ;;  %v42_v14 = vld [vmem:[#allocation4 + $0x20] sm:$0xff]  ;;  %37 = vst.msk [vmem:[#allocation3] sm:$0x3] %vm35_vm0, %v355_v36  ;;  %v88_v48 = vand.u32 127, %v87_v46 }
   0x9   :  { %68 = vadd.xlane.f32.xlu1 %v67_v3  ;;  %v41_v10 = vld [vmem:[#allocation4 + $0x18] sm:$0xff]  ;;  %v70_v11 = vadd.f32 %v49_v8, %v48_v7  ;;  %v43_v15 = vld [vmem:[#allocation4 + $0x28] sm:$0xff]  ;;  %v131_v16 = vmax.f32 %v48_v7, %v49_v8  ;;  %v50_v19 = vld [vmem:[#allocation4 + $0x60] sm:$0xff]  ;;  %v356_v54 = vmov 256.0   ;;  %vm92_vm1 = vcmask 130112   ;;  %s272_s30 = sshll.u32 %s424_s3, 4  ;;  %s273_s30 = int_to_ptr.hbm [resolvable:$true] %s272_s30 }
   0xa   :  { %117 = vmax.xlane.f32.xlu2 %v116_v5  ;;  %56 = vadd.xlane.f32.xlu0 %v55_v6  ;;  %v119_v12 = vmax.f32 %v40_v9, %v41_v10  ;;  %v58_v13 = vadd.f32 %v41_v10, %v40_v9  ;;  %v61_v17 = vadd.f32 %v43_v15, %v42_v14  ;;  %v51_v20 = vld [vmem:[#allocation4 + $0x68] sm:$0xff]  ;;  %v52_v24 = vld [vmem:[#allocation4 + $0x70] sm:$0xff]  ;;  %v53_v25 = vld [vmem:[#allocation4 + $0x78] sm:$0xff]  ;;  %v90_v50 = vadd.s32 4294967288, %v88_v48 }
   0xb   :  { %v122_v21 = vmax.f32 %v42_v14, %v43_v15  ;;  %v134_v22 = vmax.f32 %v50_v19, %v51_v20  ;;  %v73_v23 = vadd.f32 %v51_v20, %v50_v19  ;;  %v44_v26 = vld [vmem:[#allocation4 + $0x30] sm:$0xff]  ;;  %v45_v27 = vld [vmem:[#allocation4 + $0x38] sm:$0xff]  ;;  %v76_v28 = vadd.f32 %v53_v25, %v52_v24  ;;  %v185_v45 = vld [vmem:[%s422_s1 + $0x8] sm:$0xff] }
   0xc   :  { %v125_v29 = vmax.f32 %v44_v26, %v45_v27  ;;  %v64_v30 = vadd.f32 %v45_v27, %v44_v26  ;;  %v137_v31 = vmax.f32 %v52_v24, %v53_v25  ;;  %v187_v41 = vld [vmem:[%s422_s1 + $0x18] sm:$0xff]  ;;  %v186_v42 = vld [vmem:[%s422_s1 + $0x10] sm:$0xff]  ;;  %v184_v47 = vld [vmem:[%s422_s1] sm:$0xff]  ;;  %v94_v52 = vadd.s32 4294967280, %v88_v48 }
   0xd   :  { %204 = vmatpush.msra.mxu0 %v187_v41  ;;  %293 = vrcp.f32 %v356_v54  ;;  %v98_v57 = vadd.s32 4294967272, %v88_v48  ;;  %vm96_vm2 = vcmask 195712   ;;  %vm100_vm3 = vcmask 261312   ;;  %v213_v41 = vld [vmem:[%s423_s2] sm:$0x3]  ;;  %s357_s2 = smov [#allocation7]  }
   0xe   :  { %vm109_vm4 = vcmask 1041409   ;;  %v54_v8 = vld [vmem:[#allocation2] sm:$0x3]  ;;  %vm182_vm6 = vcmask 1041408   ;;  %vm188_vm7 = vcmask 261120   ;;  %vm214_vm8 = vcmask 15360  }
   0xf   :  { %205 = vmatpush.msra.mxu0 %v186_v42  ;;  %283 = vmatpush.msk.msra.mxu1 %vm182_vm6, %v213_v41  ;;  %s270_s27 = sshll.u32 %s357_s2, 4  ;;  %s271_s27 = int_to_ptr.vmem [resolvable:$true] %s270_s27 }
  0x11   :  { %71 = vadd.xlane.f32.xlu1 %v70_v11  ;;  %206 = vmatpush.msra.mxu0 %v185_v45 }
  0x12   :  { %120 = vmax.xlane.f32.xlu2 %v119_v12  ;;  %59 = vadd.xlane.f32.xlu0 %v58_v13 }
  0x13   :  { %207 = vmatpush.msra.mxu0 %v184_v47  ;;  %v294_v2 = vpop.eup %293 }
  0x14   :  { %v171_v13 = vmul.f32 256.0, %v294_v2  ;;  %vm175_vm5 = vweird.f32 %v294_v2 }
  0x19   :  { %132 = vmax.xlane.f32.xlu1 %v131_v16 }
  0x1a   :  { %62 = vadd.xlane.f32.xlu2 %v61_v17  ;;  %129 = vmax.xlane.f32.xlu0 %v128_v18 }
  0x21   :  { %123 = vmax.xlane.f32.xlu1 %v122_v21 }
  0x22   :  { %135 = vmax.xlane.f32.xlu2 %v134_v22  ;;  %74 = vadd.xlane.f32.xlu0 %v73_v23  ;;  %v172_v22 = vsub.f32 1.0, %v171_v13 }
  0x24   :  { %v173_v32 = vmul.f32 %v294_v2, %v172_v22 }
  0x29   :  { %77 = vadd.xlane.f32.xlu1 %v76_v28  ;;  %v115_v28 = vld [vmem:[#allocation3] sm:$0x3] }
  0x2a   :  { %126 = vmax.xlane.f32.xlu2 %v125_v29  ;;  %65 = vadd.xlane.f32.xlu0 %v64_v30 }
  0x32   :  { %138 = vmax.xlane.f32.xlu0 %v137_v31 }
  0x7c   :  { %v69_v33 = vpop.xlane.xlu1 %68 }
  0x7d   :  { %v382_v34 = vpop.xlane.xlu2 %117  ;;  %v57_v35 = vpop.xlane.xlu0 %56  ;;  %v102_v55 = vperm.slane %v69_v33, %v88_v48 }
  0x7e   :  { %v89_v61 = vperm.slane %v57_v35, %v88_v48  ;;  %v148_v10 = vperm.slane %v382_v34, %v88_v48  ;;  %v174_v34 = vadd.f32 %v294_v2, %v173_v32 }
  0x80   :  { %v176_v36 = vsel %vm175_vm5, %v294_v2, %v174_v34 }
  0x84   :  { %v72_v37 = vpop.xlane.xlu1 %71 }
  0x85   :  { %v121_v38 = vpop.xlane.xlu2 %120  ;;  %v60_v39 = vpop.xlane.xlu0 %59  ;;  %v103_v56 = vperm.slane %v72_v37, %v90_v50 }
  0x86   :  { %v91_v58 = vperm.slane %v60_v39, %v90_v50  ;;  %v149_v14 = vperm.slane %v121_v38, %v90_v50 }
  0x87   :  { %v104_v63 = vsel %vm92_vm1, %v103_v56, %v102_v55 }
  0x88   :  { %v93_v3 = vsel %vm92_vm1, %v91_v58, %v89_v61  ;;  %v150_v23 = vsel %vm92_vm1, %v149_v14, %v148_v10 }
  0x8c   :  { %v133_v40 = vpop.xlane.xlu1 %132 }
  0x8d   :  { %v63_v43 = vpop.xlane.xlu2 %62  ;;  %v130_v44 = vpop.xlane.xlu0 %129  ;;  %v156_v15 = vperm.slane %v133_v40, %v90_v50 }
  0x8e   :  { %v95_v60 = vperm.slane %v63_v43, %v94_v52  ;;  %v155_v16 = vperm.slane %v130_v44, %v88_v48 }
  0x90   :  { %v97_v6 = vsel %vm96_vm2, %v95_v60, %v93_v3  ;;  %v157_v24 = vsel %vm92_vm1, %v156_v15, %v155_v16 }
  0x94   :  { %v124_v49 = vpop.xlane.xlu1 %123 }
  0x95   :  { %v75_v51 = vpop.xlane.xlu0 %74  ;;  %v136_v53 = vpop.xlane.xlu2 %135  ;;  %v151_v18 = vperm.slane %v124_v49, %v94_v52 }
  0x96   :  { %v105_v59 = vperm.slane %v75_v51, %v94_v52  ;;  %v158_v19 = vperm.slane %v136_v53, %v94_v52 }
  0x97   :  { %v152_v26 = vsel %vm96_vm2, %v151_v18, %v150_v23 }
  0x98   :  { %v106_v4 = vsel %vm96_vm2, %v105_v59, %v104_v63  ;;  %v159_v27 = vsel %vm96_vm2, %v158_v19, %v157_v24 }
  0x9c   :  { %v78_v62 = vpop.xlane.xlu1 %77 }
  0x9d   :  { %v107_v0 = vperm.slane %v78_v62, %v98_v57  ;;  %v66_v1 = vpop.xlane.xlu0 %65  ;;  %v127_v11 = vpop.xlane.xlu2 %126 }
  0x9e   :  { %v99_v5 = vperm.slane %v66_v1, %v98_v57  ;;  %v153_v20 = vperm.slane %v127_v11, %v98_v57 }
  0x9f   :  { %v108_v7 = vsel %vm100_vm3, %v107_v0, %v106_v4 }
  0xa0   :  { %v101_v9 = vsel %vm100_vm3, %v99_v5, %v97_v6  ;;  %v154_v29 = vsel %vm100_vm3, %v153_v20, %v152_v26 }
  0xa1   :  { %v110_v12 = vsel %vm109_vm4, %v108_v7, %v101_v9 }
  0xa2   :  { %v112_v17 = vadd.f32 %v110_v12, %v54_v8 }
  0xa4   :  { %114 = vst.msk [vmem:[#allocation2] sm:$0x3] %vm35_vm0, %v112_v17 }
  0xa5   :  { %v139_v21 = vpop.xlane.xlu0 %138 }
  0xa6   :  { %v160_v25 = vperm.slane %v139_v21, %v98_v57 }
  0xa8   :  { %v161_v30 = vsel %vm100_vm3, %v160_v25, %v159_v27 }
  0xa9   :  { %v162_v31 = vsel %vm109_vm4, %v161_v30, %v154_v29 }
  0xaa   :  { %v164_v33 = vmax.f32 %v115_v28, %v162_v31 }
  0xab   :  { %v169_v35 = vld [vmem:[#allocation2] sm:$0x3] }
  0xac   :  { %165 = vst.msk [vmem:[#allocation3] sm:$0x3] %vm35_vm0, %v164_v33  ;;  %v177_v38 = vmul.f32 %v176_v36, %v169_v35 }
  0xb3   :  { %v178_v37 = vld [vmem:[#allocation3] sm:$0x3] }
  0xb4   :  { %v180_v39 = vrot.slane %v178_v37, 6 }
  0xb6   :  { %v183_v40 = vsel %vm182_vm6, %v177_v38, %v180_v39 }
  0xb7   :  { %282 = vmatmul.msk.f32.vlgmr.msra.gmra.mxu0 %vm188_vm7, %v183_v40 }
 0x134   :  { %v209_v42 = vpop.f32.mrf.mxu0 }
 0x135   :  { %v212_v43 = vmax.f32 %v209_v42, 0.0 }
 0x137   :  { %284 = vmatmul.msk.f32.vlgmr.msra.gmra.mxu1 %vm214_vm8, %v212_v43 }
 0x1b4   :  { %v238_v44 = vpop.f32.mrf.mxu1 }
 0x1b5   :  { %v242_v45 = vrot.slane %v238_v44, 2 }
 0x1b7   :  { %v244_v46 = vadd.f32 %v242_v45, %v238_v44 }
 0x1b9   :  { %v285_v47 = vmul.f32 -1.442695, %v244_v46 }
 0x1bb   :  { %295 = vpow2.f32 %v285_v47 }
 0x1c1   :  { %v296_v48 = vpop.eup %295 }
 0x1c2   :  { %v248_v49 = vadd.f32 1.0, %v296_v48 }
 0x1c4   :  { %297 = vrcp.f32 %v248_v49  ;;  %v260_v53 = vand.u32 2147483648, %v248_v49  ;;  %v258_v55 = vand.u32 2147483647, %v248_v49  ;;  %vm254_vm10 = vweird.f32 %v248_v49 }
 0x1c6   :  { %v261_v57 = vor.u32 1.1754944e-38, %v260_v53  ;;  %vm259_vm12 = vcmp.eq.f32.partialorder %v258_v55, 8.507059e+37 }
 0x1ca   :  { %v298_v50 = vpop.eup %297 }
 0x1cb   :  { %v250_v51 = vmul.f32 %v298_v50, %v248_v49  ;;  %vm255_vm9 = vweird.f32 %v298_v50 }
 0x1cc   :  { %vm256_vm11 = vmor %vm254_vm10, %vm255_vm9 }
 0x1cd   :  { %v251_v52 = vsub.f32 1.0, %v250_v51 }
 0x1cf   :  { %v252_v54 = vmul.f32 %v298_v50, %v251_v52 }
 0x1d1   :  { %v253_v56 = vadd.f32 %v298_v50, %v252_v54 }
 0x1d3   :  { %v257_v58 = vsel %vm256_vm11, %v298_v50, %v253_v56 }
 0x1d4   :  { %v262_v59 = vsel %vm259_vm12, %v261_v57, %v257_v58 }
 0x1d5   :  { %264 = vst.msk [vmem:[#allocation7] sm:$0x3] %vm35_vm0, %v262_v59 }
 0x1d6   :  { %275 = dma.vmem_to_hbm [thread:$0]  %s271_s27, 32, %s273_s30, [#allocation6]  }
 0x1d7   :  { %349 = dma.done.wait [#allocation6], 32  }
 0x1d8   :  { %350 = vsyncadd [#allocation6], 4294967264 }
 0x1d9   :  { %280 = vsyncpa [#allocation5], 1 }
 0x1da   :  { %281 = vsyncpa [#allocation6], 1 }

</bundles_post_ra>
